<compile_context>
chip_gen: v5e
topology: v5e:2x2
jax: 0.10.0
libtpu: 0.0.40
codegen_flags: <defaults>
</compile_context>

<pallas_src>
import jax
import jax.numpy as jnp
import numpy as np
from jax.experimental import pallas as pl
from jax.experimental.pallas import tpu as pltpu

# ----- small config consistent with the module's __init__ -----
N_AGENTS    = 8
IN_DIM      = 16    # config.IN_DIM (vector observation)
HIDDEN      = 32    # config.HIDDEN
EMBED       = 32    # config.EMBED
ACTION_SIZE = 5     # config.ACTION_SIZE
N_CATEG     = 4     # discrete latent: #categoricals
N_CLASSES   = 8     # discrete latent: #classes per categorical
STOCH       = N_CATEG * N_CLASSES      # stochastic state size (32)
DETER       = 32    # deterministic (GRU) state size
MODEL_HID   = 32    # config.MODEL_HIDDEN (GRU input size)

LANES = 128

# ----- data-slab lane offsets (one (A, 128) slab per timestep) -----
D_OBS = 0                      # obs   : lanes [0, 16)
D_ACT = IN_DIM                 # act   : lanes [16, 21)
D_ST  = 32                     # stoch : lanes [32, 64)
D_DET = 64                     # deter : lanes [64, 96)

# ----- weight-slab row offsets (all weights packed into one (288, 128) array) -----
R_W0  = 0      # (64, 64): data[:,0:64]  -> [enc_h1 | rnn_x]     (we1 / wr_a / wr_s)
R_WHH = 64     # (32, 96): data[:,64:96] -> GRU gh               (whh, compact)
R_W1  = 96     # (64,128): [enc_h1|rnn_x]-> [enc_h2 | gi]        (we2 / wih)
R_WE3 = 160    # (32, 32): enc_h2 -> obs_embed                   (we3)
R_WP1 = 192    # (64, 32): [deter | embed] -> posterior hidden   (wp1_d / wp1_e)
R_WP2 = 256    # (32, 32): posterior hidden -> logits            (wp2)
W_ROWS = 288

# ----- bias-slab row groups (each pre-broadcast to A rows) -----
B_0, B_1, B_HH, B_E3, B_P1, B_P2 = 0, 1, 2, 3, 4, 5
NB = 6


def dreamer_step_kernel(xa_ref, s0_ref, w_ref, b_ref, out_ref, st_ref):
    """One RSSM representation step; grid axis 0 is the time/rollout axis."""
    f32 = jnp.float32
    A = xa_ref.shape[0]
    t = pl.program_id(0)

    # Initialize the carried state slab from the initial-state input at t == 0.
    @pl.when(t == 0)
    def _():
        st_ref[...] = s0_ref[...]

    # data = [obs | act | 0 | stoch | deter | 0]  (obs/act from the per-t block,
    # stoch/deter from the VMEM-carried state; disjoint lanes -> plain add).
    data = xa_ref[...] + st_ref[...]                              # (A, 128)
    h_prev = data[:, D_DET:D_DET + DETER]                         # (A, 32)

    # ---- fused: observation-encoder L1 + transition.agent_rnn_input_model ----
    w0 = w_ref[R_W0:R_W0 + 64, 0:HIDDEN + MODEL_HID]              # (64, 64)
    b0 = b_ref[B_0 * A:(B_0 + 1) * A, 0:HIDDEN + MODEL_HID]       # (A, 64)
    y = jnp.maximum(jnp.dot(data[:, 0:64], w0, preferred_element_type=f32) + b0, 0.0)
    #   y = [enc_h1 | rnn_x]

    # ---- GRU hidden-hidden (compact (32, 96) block) ----
    whh = w_ref[R_WHH:R_WHH + DETER, 0:3 * DETER]                 # (32, 96)
    bhh = b_ref[B_HH * A:(B_HH + 1) * A, 0:3 * DETER]
    gh = jnp.dot(h_prev, whh, preferred_element_type=f32) + bhh   # (A, 96)

    # ---- fused: observation-encoder L2 + GRU input-hidden ----
    w1 = w_ref[R_W1:R_W1 + HIDDEN + MODEL_HID, 0:LANES]           # (64, 128)
    b1 = b_ref[B_1 * A:(B_1 + 1) * A, 0:LANES]
    z1 = jnp.dot(y, w1, preferred_element_type=f32) + b1
    h2 = jnp.maximum(z1[:, 0:HIDDEN], 0.0)                        # encoder hidden 2
    gi = z1[:, HIDDEN:HIDDEN + 3 * DETER]                         # GRU gi (A, 96)

    # ---- GRU cell (PyTorch gate order r, z, n) ----
    r = jax.nn.sigmoid(gi[:, 0:DETER] + gh[:, 0:DETER])
    z = jax.nn.sigmoid(gi[:, DETER:2 * DETER] + gh[:, DETER:2 * DETER])
    n = jnp.tanh(gi[:, 2 * DETER:3 * DETER] + r * gh[:, 2 * DETER:3 * DETER])
    h_new = (1.0 - z) * n + z * h_prev                            # (A, 32) deter state

    # ---- observation-encoder L3 -> obs embedding ----
    we3 = w_ref[R_WE3:R_WE3 + HIDDEN, 0:EMBED]
    be3 = b_ref[B_E3 * A:(B_E3 + 1) * A, 0:EMBED]
    embed = jnp.dot(h2, we3, preferred_element_type=f32) + be3

    # ---- stochastic posterior: Linear(cat[deter, embed]) -> ReLU -> Linear ----
    feat = jnp.concatenate([h_new, embed], axis=-1)               # (A, 64)
    wp1 = w_ref[R_WP1:R_WP1 + DETER + EMBED, 0:HIDDEN]
    bp1 = b_ref[B_P1 * A:(B_P1 + 1) * A, 0:HIDDEN]
    p = jnp.maximum(jnp.dot(feat, wp1, preferred_element_type=f32) + bp1, 0.0)
    wp2 = w_ref[R_WP2:R_WP2 + HIDDEN, 0:STOCH]
    bp2 = b_ref[B_P2 * A:(B_P2 + 1) * A, 0:STOCH]
    logits = jnp.dot(p, wp2, preferred_element_type=f32) + bp2    # (A, 32)

    # ---- discrete latent "sample": one-hot at the per-categorical mode ----
    # TODO(synk): PyTorch samples OneHotCategorical(logits) with straight-through;
    #             deterministic argmax (mode) is used here instead of a random draw.
    pos = jax.lax.broadcasted_iota(jnp.int32, (A, STOCH), 1)
    onehot = jnp.zeros((A, STOCH), f32)
    NEG = jnp.float32(-3.0e38)
    for c in range(N_CATEG):
        in_c = (pos >= c * N_CLASSES) & (pos < (c + 1) * N_CLASSES)
        blk = jnp.where(in_c, logits, NEG)
        m = jnp.max(blk, axis=-1, keepdims=True)
        first = jnp.min(jnp.where(blk >= m, pos, STOCH), axis=-1, keepdims=True)
        onehot = onehot + jnp.where(pos == first, 1.0, 0.0).astype(f32)

    # ---- single lane-dense store: [logits | stoch | deter | pad]; also carry state ----
    zpad = jnp.zeros((A, 32), f32)
    out_ref[...] = jnp.concatenate([logits, onehot, h_new, zpad], axis=-1)
    st_ref[...] = jnp.concatenate([zpad, onehot, h_new, zpad], axis=-1)


def init_params(key):
    """Deterministic synthetic parameters (Linear weights stored as (in, out))."""
    names_shapes = [
        ("we1", (IN_DIM, HIDDEN)), ("be1", (1, HIDDEN)),
        ("we2", (HIDDEN, HIDDEN)), ("be2", (1, HIDDEN)),
        ("we3", (HIDDEN, EMBED)),  ("be3", (1, EMBED)),
        ("wr_a", (ACTION_SIZE, MODEL_HID)), ("wr_s", (STOCH, MODEL_HID)), ("br", (1, MODEL_HID)),
        ("wih", (MODEL_HID, 3 * DETER)), ("bih", (1, 3 * DETER)),
        ("whh", (DETER, 3 * DETER)),     ("bhh", (1, 3 * DETER)),
        ("wp1_d", (DETER, HIDDEN)), ("wp1_e", (EMBED, HIDDEN)), ("bp1", (1, HIDDEN)),
        ("wp2", (HIDDEN, STOCH)),   ("bp2", (1, STOCH)),
    ]
    params = {}
    keys = jax.random.split(key, len(names_shapes))
    for k, (name, shape) in zip(keys, names_shapes):
        params[name] = 0.1 * jax.random.normal(k, shape, dtype=jnp.float32)
    return params


def pack_params(P, n_agents):
    """Pack weights into one (288, 128) slab and biases (pre-broadcast to A rows)
    into one (48, 128) slab.  Done once per parameter set; the kernel slices
    with static, sublane-aligned offsets."""
    W = jnp.zeros((W_ROWS, LANES), jnp.float32)
    # W0: data[:, 0:64] -> [enc_h1 | rnn_x]
    W = W.at[R_W0 + D_OBS:R_W0 + D_OBS + IN_DIM, 0:HIDDEN].set(P["we1"])
    W = W.at[R_W0 + D_ACT:R_W0 + D_ACT + ACTION_SIZE, HIDDEN:HIDDEN + MODEL_HID].set(P["wr_a"])
    W = W.at[R_W0 + D_ST:R_W0 + D_ST + STOCH, HIDDEN:HIDDEN + MODEL_HID].set(P["wr_s"])
    # compact whh: deter -> GRU gh
    W = W.at[R_WHH:R_WHH + DETER, 0:3 * DETER].set(P["whh"])
    # W1: [enc_h1 | rnn_x] -> [enc_h2 | gi]
    W = W.at[R_W1:R_W1 + HIDDEN, 0:HIDDEN].set(P["we2"])
    W = W.at[R_W1 + HIDDEN:R_W1 + HIDDEN + MODEL_HID, HIDDEN:HIDDEN + 3 * DETER].set(P["wih"])
    # encoder L3, posterior
    W = W.at[R_WE3:R_WE3 + HIDDEN, 0:EMBED].set(P["we3"])
    W = W.at[R_WP1:R_WP1 + DETER, 0:HIDDEN].set(P["wp1_d"])
    W = W.at[R_WP1 + DETER:R_WP1 + DETER + EMBED, 0:HIDDEN].set(P["wp1_e"])
    W = W.at[R_WP2:R_WP2 + HIDDEN, 0:STOCH].set(P["wp2"])

    def brow(vecs_and_offsets):
        row = jnp.zeros((1, LANES), jnp.float32)
        for vec, off in vecs_and_offsets:
            v = vec.reshape(-1)
            row = row.at[0, off:off + v.shape[0]].set(v)
        return jnp.tile(row, (n_agents, 1))

    B = jnp.concatenate([
        brow([(P["be1"], 0), (P["br"], HIDDEN)]),          # B_0
        brow([(P["be2"], 0), (P["bih"], HIDDEN)]),          # B_1
        brow([(P["bhh"], 0)]),                              # B_HH
        brow([(P["be3"], 0)]),                              # B_E3
        brow([(P["bp1"], 0)]),                              # B_P1
        brow([(P["bp2"], 0)]),                              # B_P2
    ], axis=0)
    return W, B


def dreamer_rollout(observations, actions, init_stoch, init_deter, wslab, bslab):
    """Rollout of the representation step over T timesteps in ONE pallas_call.
       observations: (T, A, IN_DIM), actions: (T, A, ACTION_SIZE),
       init_stoch: (A, STOCH), init_deter: (A, DETER)."""
    T, A, _ = observations.shape

    # per-step obs/act slab (stoch/deter lanes left zero; the kernel adds the state)
    xa = jnp.zeros((T, A, LANES), jnp.float32)
    xa = xa.at[:, :, D_OBS:D_OBS + IN_DIM].set(observations)
    xa = xa.at[:, :, D_ACT:D_ACT + ACTION_SIZE].set(actions)

    s0 = jnp.zeros((A, LANES), jnp.float32)
    s0 = s0.at[:, D_ST:D_ST + STOCH].set(init_stoch)
    s0 = s0.at[:, D_DET:D_DET + DETER].set(init_deter)

    flops = int(2 * A * (64 * 64 + 32 * 96 + 64 * 128 + 32 * 32 + 64 * 32 + 32 * 32) * T)
    transcendentals = int(3 * A * DETER * T)
    bytes_accessed = int(4 * (W_ROWS * LANES + NB * A * LANES + A * LANES
                              + 2 * T * A * LANES))

    out = pl.pallas_call(
        dreamer_step_kernel,
        grid=(T,),
        out_shape=jax.ShapeDtypeStruct((T, A, LANES), jnp.float32),
        in_specs=[
            pl.BlockSpec((None, A, LANES), lambda t: (t, 0, 0)),     # obs/act per step
            pl.BlockSpec((A, LANES), lambda t: (0, 0)),              # init state (fetched once)
            pl.BlockSpec((W_ROWS, LANES), lambda t: (0, 0)),         # weight slab (fetched once)
            pl.BlockSpec((NB * A, LANES), lambda t: (0, 0)),         # bias slab (fetched once)
        ],
        out_specs=pl.BlockSpec((None, A, LANES), lambda t: (t, 0, 0)),
        scratch_shapes=[pltpu.VMEM((A, LANES), jnp.float32)],        # carried (stoch, deter)
        compiler_params=pltpu.CompilerParams(dimension_semantics=("arbitrary",)),
        cost_estimate=pl.CostEstimate(flops=flops, transcendentals=transcendentals,
                                      bytes_accessed=bytes_accessed),
    )(xa, s0, wslab, bslab)

    logits = out[:, :, 0:STOCH]
    stoch = out[:, :, STOCH:2 * STOCH]
    deter = out[:, :, D_DET:D_DET + DETER]
    return logits, stoch, deter


def dreamer_forward(observations, prev_actions, prev_stoch, prev_deter, wslab, bslab, mask=None):
    """Single step == DreamerModel.forward / get_state_representation.
       observations: (1, A, IN_DIM), prev_actions: (1, A, ACT),
       prev_stoch: (1, A, STOCH), prev_deter: (1, A, DETER).  `mask` unused."""
    A = observations.shape[1]
    logits, stoch, deter = dreamer_rollout(
        observations.reshape(1, A, IN_DIM),
        prev_actions.reshape(1, A, ACTION_SIZE),
        prev_stoch.reshape(A, STOCH),
        prev_deter.reshape(A, DETER),
        wslab, bslab)
    return (logits.reshape(1, A, STOCH),
            stoch.reshape(1, A, STOCH),
            deter.reshape(1, A, DETER))


# ---------------- pure-JAX reference (identical semantics) ----------------
def reference_step(obs, act, st, h_prev, P):
    relu = lambda v: jnp.maximum(v, 0.0)
    h = relu(obs @ P["we1"] + P["be1"])
    h = relu(h @ P["we2"] + P["be2"])
    embed = h @ P["we3"] + P["be3"]

    x = relu(act @ P["wr_a"] + st @ P["wr_s"] + P["br"])
    gi = x @ P["wih"] + P["bih"]
    gh = h_prev @ P["whh"] + P["bhh"]
    r = jax.nn.sigmoid(gi[:, :DETER] + gh[:, :DETER])
    z = jax.nn.sigmoid(gi[:, DETER:2 * DETER] + gh[:, DETER:2 * DETER])
    n = jnp.tanh(gi[:, 2 * DETER:] + r * gh[:, 2 * DETER:])
    h_new = (1.0 - z) * n + z * h_prev

    p = relu(h_new @ P["wp1_d"] + embed @ P["wp1_e"] + P["bp1"])
    logits = p @ P["wp2"] + P["bp2"]

    lg = logits.reshape(-1, N_CATEG, N_CLASSES)
    idx = jnp.argmax(lg, axis=-1)
    onehot = jax.nn.one_hot(idx, N_CLASSES, dtype=jnp.float32).reshape(-1, STOCH)
    return logits, onehot, h_new


def reference_rollout(observations, actions, init_stoch, init_deter, P):
    T = observations.shape[0]
    st, h = init_stoch, init_deter
    Ls, Ss, Ds = [], [], []
    for t in range(T):
        logits, st, h = reference_step(observations[t], actions[t], st, h, P)
        Ls.append(logits); Ss.append(st); Ds.append(h)
    return jnp.stack(Ls), jnp.stack(Ss), jnp.stack(Ds)


if __name__ == "__main__":
    key = jax.random.PRNGKey(0)
    k_param, k_obs, k_act, k_st, k_dt = jax.random.split(key, 5)

    params = init_params(k_param)
    wslab, bslab = pack_params(params, N_AGENTS)   # packed once, reused every call

    T = 6
    observations = jax.random.normal(k_obs, (T, N_AGENTS, IN_DIM), dtype=jnp.float32)
    actions      = jax.random.normal(k_act, (T, N_AGENTS, ACTION_SIZE), dtype=jnp.float32)
    init_stoch   = jax.random.normal(k_st,  (N_AGENTS, STOCH), dtype=jnp.float32)
    init_deter   = jax.random.normal(k_dt,  (N_AGENTS, DETER), dtype=jnp.float32)

    # --- multi-step rollout: one launch, weights DMA'd once, state carried in VMEM ---
    out = dreamer_rollout(observations, actions, init_stoch, init_deter, wslab, bslab)
    out = jax.block_until_ready(out)
    ref = reference_rollout(observations, actions, init_stoch, init_deter, params)
    for got, want in zip(out, ref):
        np.testing.assert_allclose(np.asarray(got), np.asarray(want), rtol=1e-4, atol=1e-5)

    # --- single step: exactly DreamerModel.forward / get_state_representation ---
    out1 = dreamer_forward(observations[0:1], actions[0:1],
                           init_stoch.reshape(1, N_AGENTS, STOCH),
                           init_deter.reshape(1, N_AGENTS, DETER),
                           wslab, bslab)
    out1 = jax.block_until_ready(out1)
    ref1 = reference_step(observations[0], actions[0], init_stoch, init_deter, params)
    ref1 = tuple(r.reshape(1, N_AGENTS, -1) for r in ref1)
    for got, want in zip(out1, ref1):
        np.testing.assert_allclose(np.asarray(got), np.asarray(want), rtol=1e-4, atol=1e-5)

    print("KERNEL_OK")
</pallas_src>

<mosaic_0001>
module attributes {stable_mosaic.version = 11 : i64} {
  func.func @dreamer_step_kernel(%arg0: i32, %arg1: memref<1x8x128xf32, #tpu.memory_space<vmem>>, %arg2: memref<8x128xf32, #tpu.memory_space<vmem>>, %arg3: memref<288x128xf32, #tpu.memory_space<vmem>>, %arg4: memref<48x128xf32, #tpu.memory_space<vmem>>, %arg5: memref<1x8x128xf32, #tpu.memory_space<vmem>>, %arg6: memref<8x128xf32, #tpu.memory_space<vmem>>) attributes {dimension_semantics = [#tpu.dimension_semantics<arbitrary>], iteration_bounds = array<i64: 6>, scalar_prefetch = 0 : i64, scratch_operands = 1 : i64, tpu.core_type = #tpu.core_type<tc>, window_params = [{transform_indices = @transform_0, window_bounds = array<i64: 1, 8, 128>}, {pipeline_mode = #tpu.pipeline_mode<synchronous>, transform_indices = @transform_1, window_bounds = array<i64: 8, 128>}, {pipeline_mode = #tpu.pipeline_mode<synchronous>, transform_indices = @transform_2, window_bounds = array<i64: 288, 128>}, {pipeline_mode = #tpu.pipeline_mode<synchronous>, transform_indices = @transform_3, window_bounds = array<i64: 48, 128>}, {transform_indices = @transform_4, window_bounds = array<i64: 1, 8, 128>}]} {
    %c0_i32 = arith.constant 0 : i32
    %0 = arith.cmpi eq, %arg0, %c0_i32 : i32
    %1 = arith.extui %0 : i1 to i32
    %c0_i32_0 = arith.constant 0 : i32
    %2 = arith.cmpi ne, %1, %c0_i32_0 : i32
    scf.if %2 {
      %c0_65 = arith.constant 0 : index
      %c0_66 = arith.constant 0 : index
      %161 = vector.load %arg2[%c0_65, %c0_66] : memref<8x128xf32, #tpu.memory_space<vmem>>, vector<8x128xf32>
      %c0_67 = arith.constant 0 : index
      %c0_68 = arith.constant 0 : index
      %162 = vector.load %arg6[%c0_67, %c0_68] : memref<8x128xf32, #tpu.memory_space<vmem>>, vector<8x128xf32>
      tpu.vector_store %arg6[%c0_67, %c0_68], %161 {strides = array<i32>} : memref<8x128xf32, #tpu.memory_space<vmem>>, vector<8x128xf32>,
    } else {
    }
    %c0 = arith.constant 0 : index
    %c0_1 = arith.constant 0 : index
    %c0_2 = arith.constant 0 : index
    %3 = vector.load %arg1[%c0, %c0_1, %c0_2] : memref<1x8x128xf32, #tpu.memory_space<vmem>>, vector<1x8x128xf32>
    %4 = vector.shape_cast %3 : vector<1x8x128xf32> to vector<8x128xf32>
    %c0_3 = arith.constant 0 : index
    %c0_4 = arith.constant 0 : index
    %5 = vector.load %arg6[%c0_3, %c0_4] : memref<8x128xf32, #tpu.memory_space<vmem>>, vector<8x128xf32>
    %6 = arith.addf %4, %5 : vector<8x128xf32>
    %7 = vector.extract_strided_slice %6 {offsets = [0, 64], sizes = [8, 32], strides = [1, 1]} : vector<8x128xf32> to vector<8x32xf32>
    %c0_5 = arith.constant 0 : index
    %c0_6 = arith.constant 0 : index
    %8 = vector.load %arg3[%c0_5, %c0_6] : memref<288x128xf32, #tpu.memory_space<vmem>>, vector<64x64xf32>
    %c0_7 = arith.constant 0 : index
    %c0_8 = arith.constant 0 : index
    %9 = vector.load %arg4[%c0_7, %c0_8] : memref<48x128xf32, #tpu.memory_space<vmem>>, vector<8x64xf32>
    %10 = vector.extract_strided_slice %6 {offsets = [0, 0], sizes = [8, 64], strides = [1, 1]} : vector<8x128xf32> to vector<8x64xf32>
    %cst = arith.constant dense<0.000000e+00> : vector<8x64xf32>
    %11 = tpu.matmul %10, %8, %cst {dimension_numbers = #tpu.dot_dimension_numbers<[1], [0], [0], [1], [0, 0, 1, 1], [], []>} : vector<8x64xf32>, vector<64x64xf32>, vector<8x64xf32> -> vector<8x64xf32>
    %12 = arith.addf %11, %9 : vector<8x64xf32>
    %cst_9 = arith.constant 0.000000e+00 : f32
    %13 = vector.broadcast %cst_9 : f32 to vector<8x64xf32>
    %14 = arith.maximumf %12, %13 : vector<8x64xf32>
    %c64 = arith.constant 64 : index
    %c0_10 = arith.constant 0 : index
    %15 = vector.load %arg3[%c64, %c0_10] : memref<288x128xf32, #tpu.memory_space<vmem>>, vector<32x96xf32>
    %c16 = arith.constant 16 : index
    %c0_11 = arith.constant 0 : index
    %16 = vector.load %arg4[%c16, %c0_11] : memref<48x128xf32, #tpu.memory_space<vmem>>, vector<8x96xf32>
    %cst_12 = arith.constant dense<0.000000e+00> : vector<8x96xf32>
    %17 = tpu.matmul %7, %15, %cst_12 {dimension_numbers = #tpu.dot_dimension_numbers<[1], [0], [0], [1], [0, 0, 1, 1], [], []>} : vector<8x32xf32>, vector<32x96xf32>, vector<8x96xf32> -> vector<8x96xf32>
    %18 = arith.addf %17, %16 : vector<8x96xf32>
    %c96 = arith.constant 96 : index
    %c0_13 = arith.constant 0 : index
    %19 = vector.load %arg3[%c96, %c0_13] : memref<288x128xf32, #tpu.memory_space<vmem>>, vector<64x128xf32>
    %c8 = arith.constant 8 : index
    %c0_14 = arith.constant 0 : index
    %20 = vector.load %arg4[%c8, %c0_14] : memref<48x128xf32, #tpu.memory_space<vmem>>, vector<8x128xf32>
    %cst_15 = arith.constant dense<0.000000e+00> : vector<8x128xf32>
    %21 = tpu.matmul %14, %19, %cst_15 {dimension_numbers = #tpu.dot_dimension_numbers<[1], [0], [0], [1], [0, 0, 1, 1], [], []>} : vector<8x64xf32>, vector<64x128xf32>, vector<8x128xf32> -> vector<8x128xf32>
    %22 = arith.addf %21, %20 : vector<8x128xf32>
    %23 = vector.extract_strided_slice %22 {offsets = [0, 0], sizes = [8, 32], strides = [1, 1]} : vector<8x128xf32> to vector<8x32xf32>
    %cst_16 = arith.constant 0.000000e+00 : f32
    %24 = vector.broadcast %cst_16 : f32 to vector<8x32xf32>
    %25 = arith.maximumf %23, %24 : vector<8x32xf32>
    %26 = vector.extract_strided_slice %22 {offsets = [0, 32], sizes = [8, 96], strides = [1, 1]} : vector<8x128xf32> to vector<8x96xf32>
    %27 = vector.extract_strided_slice %26 {offsets = [0, 0], sizes = [8, 32], strides = [1, 1]} : vector<8x96xf32> to vector<8x32xf32>
    %28 = vector.extract_strided_slice %18 {offsets = [0, 0], sizes = [8, 32], strides = [1, 1]} : vector<8x96xf32> to vector<8x32xf32>
    %29 = arith.addf %27, %28 : vector<8x32xf32>
    %30 = arith.negf %29 : vector<8x32xf32>
    %31 = math.exp %30 : vector<8x32xf32>
    %cst_17 = arith.constant 1.000000e+00 : f32
    %32 = vector.broadcast %cst_17 : f32 to vector<8x32xf32>
    %33 = arith.addf %32, %31 : vector<8x32xf32>
    %34 = arith.divf %32, %33 : vector<8x32xf32>
    %35 = vector.extract_strided_slice %26 {offsets = [0, 32], sizes = [8, 32], strides = [1, 1]} : vector<8x96xf32> to vector<8x32xf32>
    %36 = vector.extract_strided_slice %18 {offsets = [0, 32], sizes = [8, 32], strides = [1, 1]} : vector<8x96xf32> to vector<8x32xf32>
    %37 = arith.addf %35, %36 : vector<8x32xf32>
    %38 = arith.negf %37 : vector<8x32xf32>
    %39 = math.exp %38 : vector<8x32xf32>
    %cst_18 = arith.constant 1.000000e+00 : f32
    %40 = vector.broadcast %cst_18 : f32 to vector<8x32xf32>
    %41 = arith.addf %40, %39 : vector<8x32xf32>
    %42 = arith.divf %40, %41 : vector<8x32xf32>
    %43 = vector.extract_strided_slice %26 {offsets = [0, 64], sizes = [8, 32], strides = [1, 1]} : vector<8x96xf32> to vector<8x32xf32>
    %44 = vector.extract_strided_slice %18 {offsets = [0, 64], sizes = [8, 32], strides = [1, 1]} : vector<8x96xf32> to vector<8x32xf32>
    %45 = arith.mulf %34, %44 : vector<8x32xf32>
    %46 = arith.addf %43, %45 : vector<8x32xf32>
    %47 = math.tanh %46 : vector<8x32xf32>
    %cst_19 = arith.constant 1.000000e+00 : f32
    %48 = vector.broadcast %cst_19 : f32 to vector<8x32xf32>
    %49 = arith.subf %48, %42 : vector<8x32xf32>
    %50 = arith.mulf %49, %47 : vector<8x32xf32>
    %51 = arith.mulf %42, %7 : vector<8x32xf32>
    %52 = arith.addf %50, %51 : vector<8x32xf32>
    %c160 = arith.constant 160 : index
    %c0_20 = arith.constant 0 : index
    %53 = vector.load %arg3[%c160, %c0_20] : memref<288x128xf32, #tpu.memory_space<vmem>>, vector<32x32xf32>
    %c24 = arith.constant 24 : index
    %c0_21 = arith.constant 0 : index
    %54 = vector.load %arg4[%c24, %c0_21] : memref<48x128xf32, #tpu.memory_space<vmem>>, vector<8x32xf32>
    %cst_22 = arith.constant dense<0.000000e+00> : vector<8x32xf32>
    %55 = tpu.matmul %25, %53, %cst_22 {dimension_numbers = #tpu.dot_dimension_numbers<[1], [0], [0], [1], [0, 0, 1, 1], [], []>} : vector<8x32xf32>, vector<32x32xf32>, vector<8x32xf32> -> vector<8x32xf32>
    %56 = arith.addf %55, %54 : vector<8x32xf32>
    %57 = tpu.concatenate %52, %56 in 1 : vector<8x32xf32>, vector<8x32xf32> -> vector<8x64xf32>
    %c192 = arith.constant 192 : index
    %c0_23 = arith.constant 0 : index
    %58 = vector.load %arg3[%c192, %c0_23] : memref<288x128xf32, #tpu.memory_space<vmem>>, vector<64x32xf32>
    %c32 = arith.constant 32 : index
    %c0_24 = arith.constant 0 : index
    %59 = vector.load %arg4[%c32, %c0_24] : memref<48x128xf32, #tpu.memory_space<vmem>>, vector<8x32xf32>
    %cst_25 = arith.constant dense<0.000000e+00> : vector<8x32xf32>
    %60 = tpu.matmul %57, %58, %cst_25 {dimension_numbers = #tpu.dot_dimension_numbers<[1], [0], [0], [1], [0, 0, 1, 1], [], []>} : vector<8x64xf32>, vector<64x32xf32>, vector<8x32xf32> -> vector<8x32xf32>
    %61 = arith.addf %60, %59 : vector<8x32xf32>
    %cst_26 = arith.constant 0.000000e+00 : f32
    %62 = vector.broadcast %cst_26 : f32 to vector<8x32xf32>
    %63 = arith.maximumf %61, %62 : vector<8x32xf32>
    %c256 = arith.constant 256 : index
    %c0_27 = arith.constant 0 : index
    %64 = vector.load %arg3[%c256, %c0_27] : memref<288x128xf32, #tpu.memory_space<vmem>>, vector<32x32xf32>
    %c40 = arith.constant 40 : index
    %c0_28 = arith.constant 0 : index
    %65 = vector.load %arg4[%c40, %c0_28] : memref<48x128xf32, #tpu.memory_space<vmem>>, vector<8x32xf32>
    %cst_29 = arith.constant dense<0.000000e+00> : vector<8x32xf32>
    %66 = tpu.matmul %63, %64, %cst_29 {dimension_numbers = #tpu.dot_dimension_numbers<[1], [0], [0], [1], [0, 0, 1, 1], [], []>} : vector<8x32xf32>, vector<32x32xf32>, vector<8x32xf32> -> vector<8x32xf32>
    %67 = arith.addf %66, %65 : vector<8x32xf32>
    %68 = tpu.iota {dimensions = array<i32: 1>} : vector<8x32xi32>
    %cst_30 = arith.constant 0.000000e+00 : f32
    %69 = vector.broadcast %cst_30 : f32 to vector<8x32xf32>
    %c0_i32_31 = arith.constant 0 : i32
    %70 = vector.broadcast %c0_i32_31 : i32 to vector<8x32xi32>
    %71 = arith.cmpi sge, %68, %70 : vector<8x32xi32>
    %c8_i32 = arith.constant 8 : i32
    %72 = vector.broadcast %c8_i32 : i32 to vector<8x32xi32>
    %73 = arith.cmpi slt, %68, %72 : vector<8x32xi32>
    %74 = arith.andi %71, %73 : vector<8x32xi1>
    %cst_32 = arith.constant -3.000000e+38 : f32
    %75 = vector.broadcast %cst_32 : f32 to vector<8x32xf32>
    %76 = arith.select %74, %67, %75 : vector<8x32xi1>, vector<8x32xf32>
    %cst_33 = arith.constant dense<0xFF800000> : vector<8xf32>
    %77 = vector.multi_reduction <maximumf>, %76, %cst_33 [1] : vector<8x32xf32> to vector<8xf32>
    %78 = vector.shape_cast %77 : vector<8xf32> to vector<8x1xf32>
    %79 = vector.broadcast %78 : vector<8x1xf32> to vector<8x32xf32>
    %80 = arith.cmpf oge, %76, %79 : vector<8x32xf32>
    %c32_i32 = arith.constant 32 : i32
    %81 = vector.broadcast %c32_i32 : i32 to vector<8x32xi32>
    %82 = arith.select %80, %68, %81 : vector<8x32xi1>, vector<8x32xi32>
    %cst_34 = arith.constant dense<2147483647> : vector<8xi32>
    %83 = vector.multi_reduction <minsi>, %82, %cst_34 [1] : vector<8x32xi32> to vector<8xi32>
    %84 = vector.shape_cast %83 : vector<8xi32> to vector<8x1xi32>
    %85 = vector.broadcast %84 : vector<8x1xi32> to vector<8x32xi32>
    %86 = arith.cmpi eq, %68, %85 : vector<8x32xi32>
    %cst_35 = arith.constant 1.000000e+00 : f32
    %cst_36 = arith.constant 0.000000e+00 : f32
    %87 = vector.broadcast %cst_35 : f32 to vector<8x32xf32>
    %88 = vector.broadcast %cst_36 : f32 to vector<8x32xf32>
    %89 = arith.select %86, %87, %88 : vector<8x32xi1>, vector<8x32xf32>
    %90 = arith.addf %69, %89 : vector<8x32xf32>
    %c8_i32_37 = arith.constant 8 : i32
    %91 = vector.broadcast %c8_i32_37 : i32 to vector<8x32xi32>
    %92 = arith.cmpi sge, %68, %91 : vector<8x32xi32>
    %c16_i32 = arith.constant 16 : i32
    %93 = vector.broadcast %c16_i32 : i32 to vector<8x32xi32>
    %94 = arith.cmpi slt, %68, %93 : vector<8x32xi32>
    %95 = arith.andi %92, %94 : vector<8x32xi1>
    %cst_38 = arith.constant -3.000000e+38 : f32
    %96 = vector.broadcast %cst_38 : f32 to vector<8x32xf32>
    %97 = arith.select %95, %67, %96 : vector<8x32xi1>, vector<8x32xf32>
    %cst_39 = arith.constant dense<0xFF800000> : vector<8xf32>
    %98 = vector.multi_reduction <maximumf>, %97, %cst_39 [1] : vector<8x32xf32> to vector<8xf32>
    %99 = vector.shape_cast %98 : vector<8xf32> to vector<8x1xf32>
    %100 = vector.broadcast %99 : vector<8x1xf32> to vector<8x32xf32>
    %101 = arith.cmpf oge, %97, %100 : vector<8x32xf32>
    %c32_i32_40 = arith.constant 32 : i32
    %102 = vector.broadcast %c32_i32_40 : i32 to vector<8x32xi32>
    %103 = arith.select %101, %68, %102 : vector<8x32xi1>, vector<8x32xi32>
    %cst_41 = arith.constant dense<2147483647> : vector<8xi32>
    %104 = vector.multi_reduction <minsi>, %103, %cst_41 [1] : vector<8x32xi32> to vector<8xi32>
    %105 = vector.shape_cast %104 : vector<8xi32> to vector<8x1xi32>
    %106 = vector.broadcast %105 : vector<8x1xi32> to vector<8x32xi32>
    %107 = arith.cmpi eq, %68, %106 : vector<8x32xi32>
    %cst_42 = arith.constant 1.000000e+00 : f32
    %cst_43 = arith.constant 0.000000e+00 : f32
    %108 = vector.broadcast %cst_42 : f32 to vector<8x32xf32>
    %109 = vector.broadcast %cst_43 : f32 to vector<8x32xf32>
    %110 = arith.select %107, %108, %109 : vector<8x32xi1>, vector<8x32xf32>
    %111 = arith.addf %90, %110 : vector<8x32xf32>
    %c16_i32_44 = arith.constant 16 : i32
    %112 = vector.broadcast %c16_i32_44 : i32 to vector<8x32xi32>
    %113 = arith.cmpi sge, %68, %112 : vector<8x32xi32>
    %c24_i32 = arith.constant 24 : i32
    %114 = vector.broadcast %c24_i32 : i32 to vector<8x32xi32>
    %115 = arith.cmpi slt, %68, %114 : vector<8x32xi32>
    %116 = arith.andi %113, %115 : vector<8x32xi1>
    %cst_45 = arith.constant -3.000000e+38 : f32
    %117 = vector.broadcast %cst_45 : f32 to vector<8x32xf32>
    %118 = arith.select %116, %67, %117 : vector<8x32xi1>, vector<8x32xf32>
    %cst_46 = arith.constant dense<0xFF800000> : vector<8xf32>
    %119 = vector.multi_reduction <maximumf>, %118, %cst_46 [1] : vector<8x32xf32> to vector<8xf32>
    %120 = vector.shape_cast %119 : vector<8xf32> to vector<8x1xf32>
    %121 = vector.broadcast %120 : vector<8x1xf32> to vector<8x32xf32>
    %122 = arith.cmpf oge, %118, %121 : vector<8x32xf32>
    %c32_i32_47 = arith.constant 32 : i32
    %123 = vector.broadcast %c32_i32_47 : i32 to vector<8x32xi32>
    %124 = arith.select %122, %68, %123 : vector<8x32xi1>, vector<8x32xi32>
    %cst_48 = arith.constant dense<2147483647> : vector<8xi32>
    %125 = vector.multi_reduction <minsi>, %124, %cst_48 [1] : vector<8x32xi32> to vector<8xi32>
    %126 = vector.shape_cast %125 : vector<8xi32> to vector<8x1xi32>
    %127 = vector.broadcast %126 : vector<8x1xi32> to vector<8x32xi32>
    %128 = arith.cmpi eq, %68, %127 : vector<8x32xi32>
    %cst_49 = arith.constant 1.000000e+00 : f32
    %cst_50 = arith.constant 0.000000e+00 : f32
    %129 = vector.broadcast %cst_49 : f32 to vector<8x32xf32>
    %130 = vector.broadcast %cst_50 : f32 to vector<8x32xf32>
    %131 = arith.select %128, %129, %130 : vector<8x32xi1>, vector<8x32xf32>
    %132 = arith.addf %111, %131 : vector<8x32xf32>
    %c24_i32_51 = arith.constant 24 : i32
    %133 = vector.broadcast %c24_i32_51 : i32 to vector<8x32xi32>
    %134 = arith.cmpi sge, %68, %133 : vector<8x32xi32>
    %c32_i32_52 = arith.constant 32 : i32
    %135 = vector.broadcast %c32_i32_52 : i32 to vector<8x32xi32>
    %136 = arith.cmpi slt, %68, %135 : vector<8x32xi32>
    %137 = arith.andi %134, %136 : vector<8x32xi1>
    %cst_53 = arith.constant -3.000000e+38 : f32
    %138 = vector.broadcast %cst_53 : f32 to vector<8x32xf32>
    %139 = arith.select %137, %67, %138 : vector<8x32xi1>, vector<8x32xf32>
    %cst_54 = arith.constant dense<0xFF800000> : vector<8xf32>
    %140 = vector.multi_reduction <maximumf>, %139, %cst_54 [1] : vector<8x32xf32> to vector<8xf32>
    %141 = vector.shape_cast %140 : vector<8xf32> to vector<8x1xf32>
    %142 = vector.broadcast %141 : vector<8x1xf32> to vector<8x32xf32>
    %143 = arith.cmpf oge, %139, %142 : vector<8x32xf32>
    %c32_i32_55 = arith.constant 32 : i32
    %144 = vector.broadcast %c32_i32_55 : i32 to vector<8x32xi32>
    %145 = arith.select %143, %68, %144 : vector<8x32xi1>, vector<8x32xi32>
    %cst_56 = arith.constant dense<2147483647> : vector<8xi32>
    %146 = vector.multi_reduction <minsi>, %145, %cst_56 [1] : vector<8x32xi32> to vector<8xi32>
    %147 = vector.shape_cast %146 : vector<8xi32> to vector<8x1xi32>
    %148 = vector.broadcast %147 : vector<8x1xi32> to vector<8x32xi32>
    %149 = arith.cmpi eq, %68, %148 : vector<8x32xi32>
    %cst_57 = arith.constant 1.000000e+00 : f32
    %cst_58 = arith.constant 0.000000e+00 : f32
    %150 = vector.broadcast %cst_57 : f32 to vector<8x32xf32>
    %151 = vector.broadcast %cst_58 : f32 to vector<8x32xf32>
    %152 = arith.select %149, %150, %151 : vector<8x32xi1>, vector<8x32xf32>
    %153 = arith.addf %132, %152 : vector<8x32xf32>
    %cst_59 = arith.constant 0.000000e+00 : f32
    %154 = vector.broadcast %cst_59 : f32 to vector<8x32xf32>
    %155 = tpu.concatenate %67, %153, %52, %154 in 1 : vector<8x32xf32>, vector<8x32xf32>, vector<8x32xf32>, vector<8x32xf32> -> vector<8x128xf32>
    %c0_60 = arith.constant 0 : index
    %c0_61 = arith.constant 0 : index
    %c0_62 = arith.constant 0 : index
    %156 = vector.load %arg5[%c0_60, %c0_61, %c0_62] : memref<1x8x128xf32, #tpu.memory_space<vmem>>, vector<1x8x128xf32>
    %157 = vector.shape_cast %156 : vector<1x8x128xf32> to vector<8x128xf32>
    %158 = vector.shape_cast %155 : vector<8x128xf32> to vector<1x8x128xf32>
    tpu.vector_store %arg5[%c0_60, %c0_61, %c0_62], %158 {strides = array<i32>} : memref<1x8x128xf32, #tpu.memory_space<vmem>>, vector<1x8x128xf32>,
    %159 = tpu.concatenate %154, %153, %52, %154 in 1 : vector<8x32xf32>, vector<8x32xf32>, vector<8x32xf32>, vector<8x32xf32> -> vector<8x128xf32>
    %c0_63 = arith.constant 0 : index
    %c0_64 = arith.constant 0 : index
    %160 = vector.load %arg6[%c0_63, %c0_64] : memref<8x128xf32, #tpu.memory_space<vmem>>, vector<8x128xf32>
    tpu.vector_store %arg6[%c0_63, %c0_64], %159 {strides = array<i32>} : memref<8x128xf32, #tpu.memory_space<vmem>>, vector<8x128xf32>,
    return
  }
  func.func @transform_0(%arg0: i32) -> (i32, i32, i32) {
    %c0_i32 = arith.constant 0 : i32
    %c0_i32_0 = arith.constant 0 : i32
    %c0_i32_1 = arith.constant 0 : i32
    return %arg0, %c0_i32, %c0_i32_0 : i32, i32, i32
  }
  func.func @transform_1(%arg0: i32) -> (i32, i32) {
    %c0_i32 = arith.constant 0 : i32
    %c0_i32_0 = arith.constant 0 : i32
    %c0_i32_1 = arith.constant 0 : i32
    return %c0_i32, %c0_i32_0 : i32, i32
  }
  func.func @transform_2(%arg0: i32) -> (i32, i32) {
    %c0_i32 = arith.constant 0 : i32
    %c0_i32_0 = arith.constant 0 : i32
    %c0_i32_1 = arith.constant 0 : i32
    return %c0_i32, %c0_i32_0 : i32, i32
  }
  func.func @transform_3(%arg0: i32) -> (i32, i32) {
    %c0_i32 = arith.constant 0 : i32
    %c0_i32_0 = arith.constant 0 : i32
    %c0_i32_1 = arith.constant 0 : i32
    return %c0_i32, %c0_i32_0 : i32, i32
  }
  func.func @transform_4(%arg0: i32) -> (i32, i32, i32) {
    %c0_i32 = arith.constant 0 : i32
    %c0_i32_0 = arith.constant 0 : i32
    %c0_i32_1 = arith.constant 0 : i32
    return %arg0, %c0_i32, %c0_i32_0 : i32, i32, i32
  }
}

</mosaic_0001>

<bundles_post_ra>
// kernel: tpu_custom_call.1
= control target key start
LH: loop header
LB: loop body
LE: loop exit
PB: predicated region body
PF: predicated region fallthrough
CT: control target
= control target key end

     0   :  { %9 = vsyncpa [#allocation4], 0  ;;  %s1316_s0 = inlined_call_operand.hbm [shape: f32[6,8,128], index: 0, kind: input, shape index: {}]   ;;  %s1317_s1 = inlined_call_operand.hbm [shape: f32[8,128], index: 1, kind: input, shape index: {}]   ;;  %s1318_s2 = inlined_call_operand.hbm [shape: f32[288,128], index: 2, kind: input, shape index: {}]   ;;  %s1319_s3 = inlined_call_operand.hbm [shape: f32[48,128], index: 3, kind: input, shape index: {}]   ;;  %s1320_s4 = inlined_call_operand.hbm [shape: f32[6,8,128], index: 4, kind: output, shape index: {}]  }
   0x1   :  { %11 = vsyncpa [#allocation4 + $0x1], 0 }
   0x2   :  { %12 = vsyncpa [#allocation7], 0 }
   0x3   :  { %13 = vsyncpa [#allocation10], 0 }
   0x4   :  { %14 = vsyncpa [#allocation5], 0 }
   0x5   :  { %16 = vsyncpa [#allocation5 + $0x1], 0  ;;  %s1092_s15 = smov 0   ;;  %s1094_s16 = smov 0  }
   0x6   :  { %s1096_s17 = smov 0   ;;  %s1098_s18 = smov 0  }
   0x7 LB: > { %s1113_s19 = sadd.s32 4294967295, %s1056_s18   ;;  %s747_s20 = sadd.s32 4294967294, %s1056_s18   ;;  %s1056_s18 = sphi %s1098_s18, %s1331_s18   ;;  %s1052_s17 = sphi %s1096_s17, %s1330_s17   ;;  %s1048_s16 = sphi %s1094_s16, %s1329_s16   ;;  %s1044_s15 = sphi %s1092_s15, %s1328_s15  }
   0x8   : > { %p42_p0 = scmp.ne.s32.totalorder %s1048_s16, %s1044_s15  ;;  %p43_p1 = scmp.eq.s32.totalorder %s1113_s19, 0 }
   0x9   : > { %p129_p2 = scmp.eq.s32.totalorder %s1113_s19, 5  ;;  %p135_p3 = scmp.eq.s32.totalorder %s747_s20, 5 }
   0xa   : > { %p1122_p4 = por %p43_p1, %p42_p0  ;;  %p748_p5 = scmp.ge.s32.totalorder %s1056_s18, 1 }
   0xb   : > { %p1127_p6 = por %p135_p3, %p42_p0  ;;  %p142_p7 = scmp.lt.s32.totalorder %s1056_s18, 7 }
   0xc   : > { %s154_s25 = sshll.u32 %s1317_s1, 4  ;;  %s1058_s27 = smov [#allocation6]   ;;  %s155_s25 = int_to_ptr.hbm [resolvable:$true] %s154_s25 }
   0xd   : > { %p1136_p9 = pnand %p748_p5, %p142_p7  ;;  %s156_s28 = sshll.u32 %s1058_s27, 4  ;;  %s157_s28 = int_to_ptr.vmem [resolvable:$true] %s156_s28 }
   0xe   : > { %s165_s5 = sshll.u32 %s1318_s2, 4  ;;  %s1059_s7 = smov [#allocation8]   ;;  %s166_s5 = int_to_ptr.hbm [resolvable:$true] %s165_s5 }
   0xf   : > { %p789_p10 = pneg %p1136_p9  ;;  %s167_s8 = sshll.u32 %s1059_s7, 4  ;;  %s168_s8 = int_to_ptr.vmem [resolvable:$true] %s167_s8 }
  0x10   : > { %s1060_s9 = smov 128   ;;  %s1061_s10 = smov 8  }
  0x11   : > { %p1147_p11 = pnand %p789_p10, %p43_p1  ;;  %s179_s13 = sshll.u32 %s1319_s3, 4  ;;  %s180_s13 = int_to_ptr.hbm [resolvable:$true] %s179_s13 }
  0x12   : > { %s1062_s14 = smov [#allocation9]   ;;  %s1161_s23 = sadd.s32 1, %s1056_s18  }
  0x13   : > { %792 = dma.hbm_to_vmem [thread:$0]  (!%p1147_p11), %s155_s25, 128, %s157_s28, [#allocation7]  }
  0x14   : > { %795 = dma.hbm_to_vmem [thread:$0]  (!%p1147_p11), %s166_s5, 4608, %s168_s8, [#allocation7], %s1060_s9, %s1060_s9, %s1061_s10  }
  0x15   : > { %s181_s20 = sshll.u32 %s1062_s14, 4  ;;  %s26_s24 = ssub.s32 %s1056_s18, %s1161_s23  ;;  %s182_s20 = int_to_ptr.vmem [resolvable:$true] %s181_s20 }
  0x16   : > { %798 = dma.hbm_to_vmem [thread:$0]  (!%p1147_p11), %s180_s13, 768, %s182_s20, [#allocation10], %s1060_s9, %s1060_s9, %s1061_s10  }
  0x17   : > { %s29_s25 = sadd.s32 1, %s1052_s17  ;;  %p27_p12 = scmp.eq.s32.totalorder %s26_s24, 0 }
  0x18   : > { %p36_p13 = scmp.ne.s32.totalorder %s1052_s17, %s1048_s16  ;;  %p37_p0 = scmp.eq.s32.totalorder %s1056_s18, 0 }
  0x19   : > { %s1170_s27 = scalar_select %p27_p12, %s1052_s17, %s29_s25  }
  0x1a   : > { %p1174_p3 = por %p129_p2, %p36_p13  ;;  %p810_p5 = scmp.lt.s32.totalorder %s1056_s18, 6 }
  0x1b   : > { %s195_s29 = sand.u32 1, %s1052_s17   ;;  %s754_s30 = sshll.u32 %s1056_s18, 3 }
  0x1c   : > { %p38_p7 = por %p37_p0, %p36_p13  ;;  %s753_s5 = sshll.u32 %s195_s29, 3 }
  0x1d   : > { %s203_s8 = scalar_lea.hbm %s1316_s0, %s754_s30  ;;  %s199_s10 = scalar_lea.vmem [#allocation3], %s753_s5 }
  0x1e   : > { %s205_s9 = sshll.u32 %s203_s8, 4  ;;  %s207_s11 = sshll.u32 %s199_s10, 4  ;;  %s206_s9 = int_to_ptr.hbm [resolvable:$true] %s205_s9  ;;  %s208_s11 = int_to_ptr.vmem [resolvable:$true] %s207_s11 }
  0x1f   : > { %p1184_p10 = pnand %p810_p5, %p38_p7  ;;  %s196_s13 = scalar_lea.sflag [#allocation4], %s195_s29 }
  0x20   : > { %s952_s14 = sshra.s32 %s206_s9, 4  ;;  %s959_s30 = scalar_lea.hbm %s1316_s0, 48  ;;  %s953_s14 = int_to_ptr.hbm [resolvable:$true] %s952_s14 }
  0x21   : > { %s954_s20 = scalar_lea.hbm %s953_s14, 8  ;;  %p956_p11 = pneg %p1184_p10 }
  0x22   : > { %p955_p2 = scmp.ne.s32.totalorder %s953_s14, %s954_s20  ;;  %p960_p0 = scmp.lt.s32.totalorder %s953_s14, %s1316_s0 }
  0x23   : > { %p961_p5 = scmp.lt.s32.totalorder %s959_s30, %s954_s20 }
  0x24   : > { %p957_p12 = pnand %p956_p11, %p955_p2 }
  0x25   : > { %p962_p7 = por %p961_p5, %p960_p0 }
  0x26   : > { %p958_p13 = pneg %p957_p12 }
  0x28   : > { %p963_p8 = pnand %p962_p7, %p958_p13 }
  0x2a   : > { %966 = shalt.err (!%p963_p8)
}
  0x2b   : > { %802 = dma.hbm_to_vmem [thread:$0]  (!%p1184_p10), %s206_s9, 128, %s208_s11, %s196_s13  }
  0x2c   : > { %216 = sbr.rel (%p1136_p9) target bundleno = 1535 (0x5ff), region = 36  ;;  %s1201_s29 = sand.u32 (!%p1136_p9), 1, %s1048_s16  }
  0x2d   : > { %s756_s7 = sshll.u32 (!%p1136_p9), %s1201_s29, 3  ;;  %s219_s8 = scalar_lea.sflag (!%p1136_p9), [#allocation4], %s1201_s29 }
  0x2e   : > { %s222_s10 = scalar_lea.vmem (!%p1136_p9), [#allocation3], %s756_s7 }
  0x31   : > { %1027 = dma.done.wait (%p1122_p4), %s219_s8, 128  }
  0x32   : > { %1029 = vsyncadd (%p1122_p4), %s219_s8, 4294967168 }
  0x33   : > { %1031 = dma.done.wait (%p43_p1), [#allocation7], 4736  }
  0x34   : > { %1033 = vsyncadd (%p43_p1), [#allocation7], 4294962560 }
  0x35   : > { %1035 = dma.done.wait (%p43_p1), [#allocation10], 768  }
  0x36   : > { %1037 = vsyncadd (%p43_p1), [#allocation10], 4294966528  ;;  %s1217_s26 = scalar_lea.vmem [#allocation11], %s756_s7  ;;  %p1327_p8 = scmp.ne.s32.totalorder %s1113_s19, 0 }
  0x38   : > { %266 = sbr.rel (%p1327_p8) target bundleno = 63 (0x3f), region = 56 }
  0x3d   : > { %v267_v0 = vld [vmem:[#allocation6] sm:$0xff] }
  0x3e   : > { %268 = vst [vmem:[#allocation2] sm:$0xff] %v267_v0 }
  0x3f PF: > { %v269_v1 = vld [vmem:[%s222_s10] sm:$0xff]  ;;  %v279_v3 = vld [vmem:[#allocation8 + $0x38] sm:$0xff]  ;;  %s1063_s21 = smov 64   ;;  %v276_v9 = vld [vmem:[#allocation8 + $0x20] sm:$0xff]  ;;  %vm281_vm0 = vcmask 523264   ;;  %vm313_vm1 = vcmask 261120  }
  0x40   : > { %293 = vmatpush.msra.mxu0 %v279_v3  ;;  %v278_v5 = vld [vmem:[#allocation8 + $0x30] sm:$0xff]  ;;  %v277_v6 = vld [vmem:[#allocation8 + $0x28] sm:$0xff]  ;;  %v309_v7 = vld [vmem:[#allocation8 + $0x58] sm:$0xff]  ;;  %s1064_s9 = smov 96   ;;  %s1065_s11 = smov 32  }
  0x41   : > { %v308_v8 = vld [vmem:[#allocation8 + $0x50] sm:$0xff]  ;;  %328 = vmatpush.msra.mxu1 %v309_v7  ;;  %v307_v10 = vld [vmem:[#allocation8 + $0x48] sm:$0xff]  ;;  %v275_v11 = vld [vmem:[#allocation8 + $0x18] sm:$0xff]  ;;  %s770_s12 = sshll.u32 %s1113_s19, 3  ;;  %s645_s24 = sshll.u32 %s1217_s26, 4  ;;  %s646_s24 = int_to_ptr.vmem [resolvable:$true] %s645_s24 }
  0x42   : > { %294 = vmatpush.msra.mxu0 %v278_v5  ;;  %v306_v12 = vld [vmem:[#allocation8 + $0x40] sm:$0xff]  ;;  %v274_v13 = vld [vmem:[#allocation8 + $0x10] sm:$0xff]  ;;  %v273_v14 = vld [vmem:[#allocation8 + $0x8] sm:$0xff]  ;;  %s643_s20 = scalar_lea.hbm %s1320_s4, %s770_s12  ;;  %s633_s19 = scalar_lea.sflag [#allocation5], %s1201_s29 }
  0x43   : > { %329 = vmatpush.msra.mxu1 %v308_v8  ;;  %v272_v15 = vld [vmem:[#allocation8] sm:$0xff]  ;;  %v343_v16 = vld [vmem:[#allocation8 + $0x98] sm:$0xff]  ;;  %v342_v17 = vld [vmem:[#allocation8 + $0x90] sm:$0xff]  ;;  %s647_s25 = sshll.u32 %s643_s20, 4  ;;  %s1002_s8 = scalar_lea.hbm %s1320_s4, 48  ;;  %s648_s25 = int_to_ptr.hbm [resolvable:$true] %s647_s25 }
  0x44   : > { %295 = vmatpush.msra.mxu0 %v277_v6  ;;  %356 = vmatpush.msra.mxu2 %v343_v16  ;;  %v341_v18 = vld [vmem:[#allocation8 + $0x88] sm:$0xff]  ;;  %v340_v19 = vld [vmem:[#allocation8 + $0x80] sm:$0xff]  ;;  %v339_v20 = vld [vmem:[#allocation8 + $0x78] sm:$0xff]  ;;  %s996_s30 = sshra.s32 %s648_s25, 4  ;;  %s997_s30 = int_to_ptr.hbm [resolvable:$true] %s996_s30 }
  0x45   : > { %v270_v2 = vld [vmem:[#allocation2] sm:$0xff]  ;;  %330 = vmatpush.msra.mxu1 %v307_v10  ;;  %v338_v21 = vld [vmem:[#allocation8 + $0x70] sm:$0xff]  ;;  %v337_v22 = vld [vmem:[#allocation8 + $0x68] sm:$0xff]  ;;  %s998_s5 = scalar_lea.hbm %s997_s30, 8  ;;  %p1003_p10 = scmp.lt.s32.totalorder %s997_s30, %s1320_s4 }
  0x46   : > { %v1221_v4 = vadd.f32 %v270_v2, %v269_v1  ;;  %296 = vmatpush.msra.mxu0 %v276_v9  ;;  %357 = vmatpush.msra.mxu2 %v342_v17  ;;  %v336_v23 = vld [vmem:[#allocation8 + $0x60] sm:$0xff]  ;;  %v414_v29 = vld [vmem:[#allocation8 + $0xb8] sm:$0xff]  ;;  %v310_v30 = vld [vmem:[#allocation9 + $0x10] sm:$0xff]  ;;  %p999_p1 = scmp.ne.s32.totalorder %s997_s30, %s998_s5  ;;  %p1004_p2 = scmp.lt.s32.totalorder %s1002_s8, %s998_s5 }
  0x47   : > { %331 = vmatpush.msra.mxu1 %v306_v12  ;;  %v280_v25 = vld [vmem:[#allocation9] sm:$0xff]  ;;  %431 = vmatpush.msra.mxu3 %v414_v29  ;;  %v413_v33 = vld [vmem:[#allocation8 + $0xb0] sm:$0xff]  ;;  %v412_v34 = vld [vmem:[#allocation8 + $0xa8] sm:$0xff] }
  0x48   : > { %311 = vrot.lane.b32.xlu0 %v1221_v4, %s1063_s21  ;;  %297 = vmatpush.msra.mxu0 %v275_v11  ;;  %v344_v35 = vld [vmem:[#allocation9 + $0x8] sm:$0xff]  ;;  %v411_v38 = vld [vmem:[#allocation8 + $0xa0] sm:$0xff]  ;;  %v415_v57 = vld [vmem:[#allocation9 + $0x18] sm:$0xff]  ;;  %p1000_p4 = pnand %p999_p1, %p1174_p3  ;;  %p1005_p11 = por %p1004_p2, %p1003_p10 }
  0x49   : > { %358 = vmatpush.msra.mxu2 %v341_v18  ;;  %432 = vmatpush.msra.mxu3 %v413_v33  ;;  %v455_v63 = vld [vmem:[#allocation8 + $0xf8] sm:$0xff]  ;;  %v454_v0 = vld [vmem:[#allocation8 + $0xf0] sm:$0xff]  ;;  %v453_v1 = vld [vmem:[#allocation8 + $0xe8] sm:$0xff] }
  0x4a   : > { %298 = vmatpush.msra.mxu0 %v274_v13  ;;  %468 = vmatpush.msrb.mxu1 %v455_v63  ;;  %v452_v2 = vld [vmem:[#allocation8 + $0xe0] sm:$0xff]  ;;  %v451_v3 = vld [vmem:[#allocation8 + $0xd8] sm:$0xff]  ;;  %v450_v5 = vld [vmem:[#allocation8 + $0xd0] sm:$0xff]  ;;  %p1001_p9 = pneg %p1000_p4 }
  0x4b   : > { %359 = vmatpush.msra.mxu2 %v340_v19  ;;  %433 = vmatpush.msra.mxu3 %v412_v34  ;;  %v449_v6 = vld [vmem:[#allocation8 + $0xc8] sm:$0xff]  ;;  %v448_v12 = vld [vmem:[#allocation8 + $0xc0] sm:$0xff]  ;;  %v484_v13 = vld [vmem:[#allocation8 + $0x118] sm:$0xff] }
  0x4c   : > { %299 = vmatpush.msra.mxu0 %v273_v14  ;;  %469 = vmatpush.msrb.mxu1 %v454_v0  ;;  %v483_v14 = vld [vmem:[#allocation8 + $0x110] sm:$0xff]  ;;  %v482_v18 = vld [vmem:[#allocation8 + $0x108] sm:$0xff]  ;;  %v456_v19 = vld [vmem:[#allocation9 + $0x20] sm:$0xff]  ;;  %p1006_p12 = pnand %p1005_p11, %p1001_p9 }
  0x4d   : > { %360 = vmatpush.msra.mxu2 %v339_v20  ;;  %434 = vmatpush.msra.mxu3 %v411_v38 }
  0x4e   : > { %300 = vmatpush.msra.mxu0 %v272_v15  ;;  %470 = vmatpush.msrb.mxu1 %v453_v1 }
  0x4f   : > { %762 = vmatmul.msk.f32.vlgmr.msra.gmra.mxu0 %vm281_vm0, %v1221_v4  ;;  %361 = vmatpush.msra.mxu2 %v338_v21 }
  0x50   : > { %471 = vmatpush.msrb.mxu1 %v452_v2  ;;  %501 = vmatpush.msrb.mxu3 %v484_v13 }
  0x51   : > { %362 = vmatpush.msra.mxu2 %v337_v22 }
  0x52   : > { %472 = vmatpush.msrb.mxu1 %v451_v3  ;;  %502 = vmatpush.msrb.mxu3 %v483_v14 }
  0x53   : > { %363 = vmatpush.msra.mxu2 %v336_v23  ;;  %v509_v23 = vlaneseq }
  0x54   : > { %473 = vmatpush.msrb.mxu1 %v450_v5  ;;  %503 = vmatpush.msrb.mxu3 %v482_v18 }
  0x56   : > { %474 = vmatpush.msrb.mxu1 %v449_v6 }
  0x58   : > { %475 = vmatpush.msrb.mxu1 %v448_v12 }
  0xba   : > { %v312_v24 = vpop.permute.xlu0 %311 }
  0xbb   : > { %763 = vmatmul.msk.f32.vlgmr.msra.gmra.mxu1 %vm313_vm1, %v312_v24  ;;  %v1243_v24 = vand.u32 127, %v509_v23 }
  0xbd   : > { %vm565_vm6 = vcmp.ge.s32.totalorder %v1243_v24, 16  ;;  %vm566_vm7 = vcmp.lt.s32.totalorder %v1243_v24, 24  ;;  %vm538_vm8 = vcmp.ge.s32.totalorder %v1243_v24, 8  ;;  %vm539_vm9 = vcmp.lt.s32.totalorder %v1243_v24, 16 }
  0xbe   : > { %vm567_vm10 = vmand %vm565_vm6, %vm566_vm7  ;;  %vm512_vm12 = vcmp.lt.s32.totalorder %v1243_v24, 8  ;;  %vm592_vm13 = vcmp.ge.s32.totalorder %v1243_v24, 24  ;;  %vm593_vm14 = vcmp.lt.s32.totalorder %v1243_v24, 32 }
  0xbf   : > { %vm540_vm11 = vmand %vm538_vm8, %vm539_vm9 }
  0xc0   : > { %vm594_vm15 = vmand %vm592_vm13, %vm593_vm14  ;;  %vm625_vm14 = vcmask 785408  }
  0xcc   : > { %v302_v26 = vpop.f32.mrf.mxu0 }
  0xcd   : > { %v303_v27 = vadd.f32 %v302_v26, %v280_v25  ;;  %v485_v25 = vld [vmem:[#allocation9 + $0x28] sm:$0xff] }
  0xcf   : > { %v305_v28 = vmax.f32 %v303_v27, 0.0 }
  0xd1   : > { %764 = vmatmul.msk.f32.vlgmr.msra.gmra.mxu2 %vm281_vm0, %v305_v28 }
 0x138   : > { %v333_v31 = vpop.f32.mrf.mxu1 }
 0x139   : > { %v334_v32 = vadd.f32 %v333_v31, %v310_v30 }
 0x13b   : > { %393 = vrot.lane.b32.xlu1 %v334_v32, %s1064_s9  ;;  %370 = vrot.lane.b32.xlu0 %v334_v32, %s1065_s11 }
 0x154   : > { %v365_v36 = vpop.f32.mrf.mxu2 }
 0x155   : > { %v366_v37 = vadd.f32 %v365_v36, %v344_v35 }
 0x157   : > { %v368_v39 = vmax.f32 %v366_v37, 0.0 }
 0x159   : > { %766 = vmatmul.msk.f32.vlgmr.msra.gmra.mxu3 %vm313_vm1, %v368_v39 }
 0x1ad   : > { %v371_v40 = vpop.permute.xlu0 %370  ;;  %v394_v54 = vpop.permute.xlu1 %393 }
 0x1ae   : > { %v373_v41 = vadd.f32 %v371_v40, %v366_v37 }
 0x1b0   : > { %v765_v42 = vmul.f32 -1.442695, %v373_v41 }
 0x1b2   : > { %856 = vpow2.f32 %v765_v42 }
 0x1b8   : > { %v857_v43 = vpop.eup %856 }
 0x1b9   : > { %v377_v44 = vadd.f32 1.0, %v857_v43 }
 0x1bb   : > { %858 = vrcp.f32 %v377_v44  ;;  %v389_v48 = vand.u32 2147483648, %v377_v44  ;;  %v387_v50 = vand.u32 2147483647, %v377_v44  ;;  %vm383_vm3 = vweird.f32 %v377_v44 }
 0x1bd   : > { %v390_v52 = vor.u32 1.1754944e-38, %v389_v48  ;;  %vm388_vm5 = vcmp.eq.f32.partialorder %v387_v50, 8.507059e+37 }
 0x1c1   : > { %v859_v45 = vpop.eup %858 }
 0x1c2   : > { %v379_v46 = vmul.f32 %v859_v45, %v377_v44  ;;  %vm384_vm2 = vweird.f32 %v859_v45 }
 0x1c3   : > { %vm385_vm4 = vmor %vm383_vm3, %vm384_vm2 }
 0x1c4   : > { %v380_v47 = vsub.f32 1.0, %v379_v46 }
 0x1c6   : > { %v381_v49 = vmul.f32 %v859_v45, %v380_v47 }
 0x1c8   : > { %v382_v51 = vadd.f32 %v859_v45, %v381_v49 }
 0x1ca   : > { %v386_v53 = vsel %vm385_vm4, %v859_v45, %v382_v51 }
 0x1cb   : > { %v391_v55 = vsel %vm388_vm5, %v390_v52, %v386_v53 }
 0x1cc   : > { %v396_v56 = vmul.f32 %v394_v54, %v391_v55  ;;  %v403_v7 = vsub.f32 1.0, %v391_v55  ;;  %v409_v9 = vmul.f32 %v391_v55, %v1221_v4  ;;  %v481_v4 = vld [vmem:[#allocation8 + $0x100] sm:$0xff] }
 0x1cd   : > { %504 = vmatpush.msrb.mxu3 %v481_v4 }
 0x1ce   : > { %398 = vrot.lane.b32.xlu1 %v396_v56, %s1063_s21 }
 0x1dc   : > { %v436_v58 = vpop.f32.mrf.mxu3 }
 0x1dd   : > { %v437_v59 = vadd.f32 %v436_v58, %v415_v57 }
 0x1df   : > { %444 = vrot.lane.b32.xlu0 %v437_v59, %s1065_s11 }
 0x240   : > { %v399_v60 = vpop.permute.xlu1 %398 }
 0x241   : > { %v401_v61 = vadd.f32 %v399_v60, %v366_v37 }
 0x243   : > { %860 = vtanh.f32 %v401_v61 }
 0x249   : > { %v861_v62 = vpop.eup %860 }
 0x24a   : > { %405 = vrot.lane.b32.xlu2 %v861_v62, %s1064_s9 }
 0x251   : > { %v445_v15 = vpop.permute.xlu0 %444 }
 0x2a4   : > { %v406_v8 = vpop.permute.xlu2 %405 }
 0x2a5   : > { %v408_v10 = vmul.f32 %v406_v8, %v403_v7 }
 0x2a7   : > { %v1236_v11 = vadd.f32 %v409_v9, %v408_v10 }
 0x2a9   : > { %440 = vrot.lane.b32.xlu2 %v1236_v11, %s1063_s21 }
 0x303   : > { %v441_v16 = vpop.permute.xlu2 %440 }
 0x304   : > { %v447_v17 = vsel %vm313_vm1, %v441_v16, %v445_v15 }
 0x305   : > { %767 = vmatmul.msk.f32.vlgmr.msrb.gmra.mxu1 %vm281_vm0, %v447_v17 }
 0x382   : > { %v477_v20 = vpop.f32.mrf.mxu1 }
 0x383   : > { %v478_v21 = vadd.f32 %v477_v20, %v456_v19 }
 0x385   : > { %v480_v22 = vmax.f32 %v478_v21, 0.0 }
 0x387   : > { %768 = vmatmul.msk.f32.vlgmr.msrb.gmra.mxu3 %vm313_vm1, %v480_v22 }
 0x40a   : > { %v506_v26 = vpop.f32.mrf.mxu3 }
 0x40b   : > { %v1250_v27 = vadd.f32 %v506_v26, %v485_v25  ;;  %v1066_v26 = vmov 0.0  }
 0x40d   : > { %v568_v28 = vsel %vm567_vm10, %v1250_v27, -3e+38  ;;  %v541_v29 = vsel %vm540_vm11, %v1250_v27, -3e+38  ;;  %v514_v30 = vsel %vm512_vm12, %v1250_v27, -3e+38 }
 0x40e   : > { %v569_v31 = vsel %vm313_vm1, %v568_v28, -inf  ;;  %v542_v32 = vsel %vm313_vm1, %v541_v29, -inf  ;;  %v515_v33 = vsel %vm313_vm1, %v514_v30, -inf  ;;  %v595_v34 = vsel %vm594_vm15, %v1250_v27, -3e+38 }
 0x40f   : > { %570 = vmax.xlane.f32.xlu0 %v569_v31  ;;  %543 = vmax.xlane.f32.xlu2 %v542_v32  ;;  %v596_v35 = vsel %vm313_vm1, %v595_v34, -inf }
 0x410   : > { %516 = vmax.xlane.f32.xlu1 %v515_v33 }
 0x417   : > { %597 = vmax.xlane.f32.xlu2 %v596_v35 }
 0x482   : > { %v571_v36 = vpop.xlane.xlu0 %570  ;;  %v544_v37 = vpop.xlane.xlu2 %543 }
 0x483   : > { %vm572_vm2 = vcmp.ge.f32.partialorder %v568_v28, %v571_v36  ;;  %vm545_vm3 = vcmp.ge.f32.partialorder %v541_v29, %v544_v37  ;;  %v517_v38 = vpop.xlane.xlu1 %516 }
 0x484   : > { %v573_v39 = vsel %vm572_vm2, %v1243_v24, 32  ;;  %v546_v40 = vsel %vm545_vm3, %v1243_v24, 32  ;;  %vm518_vm4 = vcmp.ge.f32.partialorder %v514_v30, %v517_v38 }
 0x485   : > { %v574_v41 = vsel %vm313_vm1, %v573_v39, 2147483647  ;;  %v547_v42 = vsel %vm313_vm1, %v546_v40, 2147483647  ;;  %v519_v43 = vsel %vm518_vm4, %v1243_v24, 32 }
 0x486   : > { %v520_v44 = vsel %vm313_vm1, %v519_v43, 2147483647  ;;  %v576_v45 = vshra.s32 %v574_v41, 16  ;;  %v549_v46 = vshra.s32 %v547_v42, 16  ;;  %v548_v56 = vand.u32 65535, %v547_v42 }
 0x487   : > { %v522_v47 = vshra.s32 %v520_v44, 16  ;;  %v575_v57 = vand.u32 65535, %v574_v41  ;;  %v521_v58 = vand.u32 65535, %v520_v44 }
 0x488   : > { %v578_v48 = vcvt.s32.f32 %v576_v45  ;;  %v551_v49 = vcvt.s32.f32 %v549_v46  ;;  %v550_v61 = vcvt.s32.f32 %v548_v56 }
 0x489   : > { %v524_v50 = vcvt.s32.f32 %v522_v47  ;;  %v577_v62 = vcvt.s32.f32 %v575_v57  ;;  %v523_v0 = vcvt.s32.f32 %v521_v58 }
 0x48a   : > { %579 = vmin.xlane.f32.xlu0 %v578_v48  ;;  %552 = vmin.xlane.f32.xlu2 %v551_v49  ;;  %v598_v51 = vpop.xlane.xlu2 %597 }
 0x48b   : > { %vm599_vm5 = vcmp.ge.f32.partialorder %v595_v34, %v598_v51  ;;  %525 = vmin.xlane.f32.xlu1 %v524_v50 }
 0x48c   : > { %v600_v52 = vsel %vm599_vm5, %v1243_v24, 32 }
 0x48d   : > { %v601_v53 = vsel %vm313_vm1, %v600_v52, 2147483647 }
 0x48e   : > { %v603_v54 = vshra.s32 %v601_v53, 16  ;;  %v602_v5 = vand.u32 65535, %v601_v53 }
 0x490   : > { %v605_v55 = vcvt.s32.f32 %v603_v54  ;;  %v604_v7 = vcvt.s32.f32 %v602_v5 }
 0x493   : > { %606 = vmin.xlane.f32.xlu1 %v605_v55 }
 0x4fd   : > { %v580_v59 = vpop.xlane.xlu0 %579  ;;  %v553_v60 = vpop.xlane.xlu2 %552 }
 0x4fe   : > { %v526_v63 = vpop.xlane.xlu1 %525  ;;  %vm554_vm6 = vcmp.eq.f32.partialorder %v551_v49, %v553_v60  ;;  %vm581_vm7 = vcmp.eq.f32.partialorder %v578_v48, %v580_v59  ;;  %v559_v9 = vcvt.f32.s32 %v553_v60  ;;  %v586_v12 = vcvt.f32.s32 %v580_v59 }
 0x4ff   : > { %v555_v1 = vsel %vm554_vm6, %v550_v61, inf  ;;  %v582_v2 = vsel %vm581_vm7, %v577_v62, inf  ;;  %vm527_vm8 = vcmp.eq.f32.partialorder %v524_v50, %v526_v63  ;;  %v532_v10 = vcvt.f32.s32 %v526_v63 }
 0x500   : > { %556 = vmin.xlane.f32.xlu0 %v555_v1  ;;  %583 = vmin.xlane.f32.xlu1 %v582_v2  ;;  %v528_v3 = vsel %vm527_vm8, %v523_v0, inf  ;;  %v560_v15 = vshll.u32 %v559_v9, 16  ;;  %v587_v21 = vshll.u32 %v586_v12, 16 }
 0x501   : > { %529 = vmin.xlane.f32.xlu2 %v528_v3  ;;  %v533_v18 = vshll.u32 %v532_v10, 16 }
 0x506   : > { %v607_v6 = vpop.xlane.xlu1 %606 }
 0x507   : > { %vm608_vm9 = vcmp.eq.f32.partialorder %v605_v55, %v607_v6  ;;  %v613_v23 = vcvt.f32.s32 %v607_v6 }
 0x508   : > { %v609_v8 = vsel %vm608_vm9, %v604_v7, inf }
 0x509   : > { %610 = vmin.xlane.f32.xlu2 %v609_v8  ;;  %v614_v31 = vshll.u32 %v613_v23, 16 }
 0x573   : > { %v557_v13 = vpop.xlane.xlu0 %556  ;;  %v584_v14 = vpop.xlane.xlu1 %583 }
 0x574   : > { %v558_v16 = vcvt.f32.s32 %v557_v13  ;;  %v530_v17 = vpop.xlane.xlu2 %529  ;;  %v585_v4 = vcvt.f32.s32 %v584_v14 }
 0x575   : > { %v531_v19 = vcvt.f32.s32 %v530_v17 }
 0x576   : > { %v561_v20 = vadd.s32 %v560_v15, %v558_v16  ;;  %v588_v25 = vadd.s32 %v587_v21, %v585_v4 }
 0x577   : > { %v534_v22 = vadd.s32 %v533_v18, %v531_v19 }
 0x578   : > { %vm562_vm10 = vcmp.eq.s32.totalorder %v1243_v24, %v561_v20  ;;  %vm589_vm12 = vcmp.eq.s32.totalorder %v1243_v24, %v588_v25 }
 0x579   : > { %vm535_vm11 = vcmp.eq.s32.totalorder %v1243_v24, %v534_v22  ;;  %v563_v28 = vsel %vm562_vm10, 1.0, %v1066_v26  ;;  %v590_v35 = vsel %vm589_vm12, 1.0, %v1066_v26 }
 0x57a   : > { %v536_v29 = vsel %vm535_vm11, 1.0, %v1066_v26 }
 0x57b   : > { %v564_v32 = vadd.f32 %v563_v28, %v536_v29 }
 0x57c   : > { %v611_v30 = vpop.xlane.xlu2 %610 }
 0x57d   : > { %v612_v33 = vcvt.f32.s32 %v611_v30  ;;  %v591_v36 = vadd.f32 %v590_v35, %v564_v32 }
 0x57f   : > { %v615_v34 = vadd.s32 %v614_v31, %v612_v33 }
 0x581   : > { %vm616_vm13 = vcmp.eq.s32.totalorder %v1243_v24, %v615_v34 }
 0x582   : > { %v617_v37 = vsel %vm616_vm13, 1.0, %v1066_v26 }
 0x583   : > { %v618_v38 = vadd.f32 %v617_v37, %v591_v36 }
 0x585   : > { %620 = vrot.lane.b32.xlu0 %v618_v38, %s1065_s11 }
 0x5f7   : > { %v621_v39 = vpop.permute.xlu0 %620 }
 0x5f8   : > { %v623_v24 = vsel %vm313_vm1, %v1250_v27, %v621_v39  ;;  %v628_v40 = vsel %vm313_vm1, 0.0, %v621_v39 }
 0x5f9   : > { %v624_v41 = vsel %vm281_vm0, %v623_v24, %v1236_v11  ;;  %v629_v42 = vsel %vm281_vm0, %v628_v40, %v1236_v11 }
 0x5fa   : > { %v630_v43 = vsel %vm625_vm14, %v629_v42, 0.0  ;;  %v626_v44 = vsel %vm625_vm14, %v624_v41, 0.0 }
 0x5fb   : > { %631 = vst [vmem:[#allocation2] sm:$0xff] %v630_v43 }
 0x5fc   : > { %627 = vst [vmem:[%s1217_s26] sm:$0xff] %v626_v44 }
 0x5fd   : > { %1009 = shalt.err (!%p1006_p12)
}
 0x5fe   : > { %787 = dma.vmem_to_hbm [thread:$0]  (%p1174_p3), %s646_s24, 128, %s648_s25, %s633_s19  }
 0x5ff PF: > { %p814_p13 = scmp.ge.s32.totalorder %s1056_s18, 2  ;;  %s659_s29 = sand.u32 1, %s1044_s15  }
 0x600   : > { %s660_s26 = scalar_lea.sflag [#allocation5], %s659_s29 }
 0x601   : > { %p804_p0 = pnand %p814_p13, %p1127_p6 }
 0x603   : > { %p805_p5 = pneg %p804_p0 }
 0x605   : > { %1039 = dma.done.wait (%p805_p5), %s660_s26, 128  }
 0x606   : > { %1041 = vsyncadd (%p805_p5), %s660_s26, 4294967168  ;;  %p19_p7 = scmp.ge.s32.totalorder %s1161_s23, 8   ;;  %s1328_s15 = smov %s1048_s16 }
 0x607   : > { %s1329_s16 = smov %s1052_s17  ;;  %s1330_s17 = smov %s1170_s27 }
 0x608   : > { %s1331_s18 = smov %s1161_s23  ;;  %21 = sbr.rel (!%p19_p7) target bundleno = 7 (0x7), region = 97 }
 0x60d   :  { %666 = vsyncpa [#allocation4], 1 }
 0x60e   :  { %668 = vsyncpa [#allocation4 + $0x1], 1 }
 0x60f   :  { %669 = vsyncpa [#allocation7], 1 }
 0x610   :  { %670 = vsyncpa [#allocation10], 1 }
 0x611   :  { %671 = vsyncpa [#allocation5], 1 }
 0x612   :  { %673 = vsyncpa [#allocation5 + $0x1], 1 }

</bundles_post_ra>
